<compile_context>
chip_gen: v7x
topology: tpu7x:2x2x1
jax: 0.10.0
libtpu: 0.0.40
codegen_flags: <defaults>
</compile_context>

<pallas_src>
import functools
import math

import jax
import jax.numpy as jnp
from jax.experimental import pallas as pl
from jax.experimental.pallas import tpu as pltpu

NEG = -1e9                             # "-inf" that stays NaN-free in f32


def _tpu_vmem_bytes():
    try:
        return int(pltpu.get_tpu_info().vmem_capacity_bytes)
    except Exception:
        return 64 * 1024 * 1024        # conservative (v7x-sized) fallback


_VMEM_CAP = _tpu_vmem_bytes()
VMEM_LIMIT = min(_VMEM_CAP * 3 // 4, 100 * 1024 * 1024)   # ~96 MiB v5e/v6e, ~48 MiB v7x
TM_TARGET = 512 if _VMEM_CAP >= 100 * 1024 * 1024 else 256


def _pick_tile(dim, target):
    """Largest divisor of dim that is <= target and a multiple of 8."""
    if dim <= target:
        return dim
    t = target
    while t >= 8:
        if dim % t == 0:
            return t
        t -= 8
    # TODO(synk): awkward (non multiple-of-8) token counts fall back to a
    # single block; pad B*S upstream if this ever matters.
    return dim


def _pick_batch_tile(B, S, Lp):
    """CRF batch-tile: bounded by VMEM (f32 emissions, double-buffered)."""
    per_row = S * Lp * 4
    cap = max(1, (VMEM_LIMIT // 4) // max(per_row, 1))
    target = min(B, 64, cap)
    for t in range(target, 0, -1):
        if B % t == 0:
            return t
    return B


def _head_grouping(D, n_heads):
    """(heads_per_group, group_lane_width) so blocks are lane-dense."""
    dh = D // n_heads
    if D <= 128:
        return n_heads, D                       # full width == full array dim
    if dh % 128 == 0:
        return 1, dh                            # each head already lane-dense
    if dh < 128 and 128 % dh == 0 and n_heads % (128 // dh) == 0:
        hpg = 128 // dh                         # e.g. dh=64 -> 2 heads / group
        return hpg, hpg * dh
    return n_heads, D


# ---------------------------------------------------------------------------
# Pallas kernels
# ---------------------------------------------------------------------------
def _qkv_kernel(x_ref, w_ref, b_ref, q_ref, k_ref, v_ref):
    # x: (tm, D) bf16, w: (D, 3D) bf16 resident, b: (1, 3D) f32.
    y = jnp.dot(x_ref[...], w_ref[...],
                preferred_element_type=jnp.float32) + b_ref[...]
    n = q_ref.shape[-1]
    q_ref[...] = y[:, :n].astype(q_ref.dtype)
    k_ref[...] = y[:, n:2 * n].astype(k_ref.dtype)
    v_ref[...] = y[:, 2 * n:].astype(v_ref.dtype)


def _linear_act_kernel(x_ref, w_ref, b_ref, o_ref, *, activation):
    # generic linear (+ optional GELU); weight block resident in VMEM.
    y = jnp.dot(x_ref[...], w_ref[...],
                preferred_element_type=jnp.float32) + b_ref[...]
    if activation == "gelu":
        # tanh-approximate GELU (HF DistilBERT uses erf GELU; diff ~1e-3)
        c = math.sqrt(2.0 / math.pi)
        y = 0.5 * y * (1.0 + jnp.tanh(c * (y + 0.044715 * y * y * y)))
    o_ref[...] = y.astype(o_ref.dtype)


def _linear_res_ln_kernel(x_ref, w_ref, b_ref, r_ref, g_ref, bb_ref,
                          o_ref, *, eps):
    # fused: (x @ w + b + residual) -> LayerNorm -> out  (LN math in f32)
    y = jnp.dot(x_ref[...], w_ref[...],
                preferred_element_type=jnp.float32) + b_ref[...]
    y = y + r_ref[...].astype(jnp.float32)
    mu = jnp.mean(y, axis=-1, keepdims=True)
    var = jnp.mean((y - mu) ** 2, axis=-1, keepdims=True)
    o_ref[...] = ((y - mu) * jax.lax.rsqrt(var + eps) * g_ref[...]
                  + bb_ref[...]).astype(o_ref.dtype)


def _layernorm_kernel(x_ref, g_ref, b_ref, o_ref, *, eps):
    x = x_ref[...].astype(jnp.float32)
    mu = jnp.mean(x, axis=-1, keepdims=True)
    var = jnp.mean((x - mu) ** 2, axis=-1, keepdims=True)
    o_ref[...] = ((x - mu) * jax.lax.rsqrt(var + eps) * g_ref[...]
                  + b_ref[...]).astype(o_ref.dtype)


def _attention_kernel(q_ref, k_ref, v_ref, mb_ref, o_ref, *, heads, scale):
    # One grid step = one (batch row, head group).  q/k/v/o: (S, gw), mb: (1, S).
    mb = mb_ref[...].astype(jnp.float32)
    dh = q_ref.shape[-1] // heads
    ctxs = []
    for h in range(heads):                         # tiny static loop (group size)
        sl = pl.ds(h * dh, dh)
        qh = q_ref[:, sl]
        kh = k_ref[:, sl]
        vh = v_ref[:, sl]
        # scores[i,j] = sum_d q[i,d] k[j,d]   (no explicit transpose of K)
        scores = jax.lax.dot_general(qh, kh, (((1,), (1,)), ((), ())),
                                     preferred_element_type=jnp.float32)
        scores = scores * scale + mb
        scores = scores - jnp.max(scores, axis=-1, keepdims=True)
        p = jnp.exp(scores)
        p = p * pl.reciprocal(jnp.sum(p, axis=-1, keepdims=True), approx=True)
        ctx = jax.lax.dot_general(p.astype(vh.dtype), vh,
                                  (((1,), (0,)), ((), ())),
                                  preferred_element_type=jnp.float32)
        ctxs.append(ctx)
    out = ctxs[0] if len(ctxs) == 1 else jnp.concatenate(ctxs, axis=-1)
    o_ref[...] = out.astype(o_ref.dtype)           # single lane-dense store


def _crf_nll_kernel(em_ref, lab_ref, mask_ref, trans_ref, start_ref, end_ref,
                    o_ref, *, seq_len):
    # em: (tb, S, Lp) raw logits f32; lab: (tb, S, 1) int32; mask: (tb, S, 1) f32
    # trans: (Lp, Lp); start/end: (1, Lp).  Padded tags carry -1e9 everywhere.
    trans = trans_ref[...]
    start = start_ref[...]
    end = end_ref[...]
    n_tags = trans.shape[-1]
    iota_l = jax.lax.broadcasted_iota(jnp.int32, (1, n_tags), 1)

    # hoisted: max-shifted exp(trans) so the forward step is one MXU matmul
    t_max = jnp.max(trans)
    exp_trans = jnp.exp(trans - t_max)

    def log_softmax(x):                               # (tb, Lp)
        x = x - jnp.max(x, axis=-1, keepdims=True)
        return x - jnp.log(jnp.sum(jnp.exp(x), axis=-1, keepdims=True))

    def read_t(ref, t):                               # (tb, last-dim)
        return ref[:, pl.ds(t, 1), :][:, 0, :]

    em0 = log_softmax(read_t(em_ref, 0))
    oh0 = (read_t(lab_ref, 0) == iota_l).astype(jnp.float32)
    score0 = jnp.sum((start + em0) * oh0, axis=-1, keepdims=True)   # (tb, 1)
    alpha0 = start + em0                                            # (tb, Lp)

    def body(t, carry):
        score, alpha, prev_oh, last_oh = carry
        em_t = log_softmax(read_t(em_ref, t))         # (tb, Lp)
        oh_t = (read_t(lab_ref, t) == iota_l).astype(jnp.float32)
        m_t = read_t(mask_ref, t)                     # (tb, 1)
        keep = m_t > 0.5

        # numerator: transition(prev->cur) + emission(cur), masked
        t_row = jnp.dot(prev_oh, trans, preferred_element_type=jnp.float32)
        step = jnp.sum((t_row + em_t) * oh_t, axis=-1, keepdims=True)
        score = score + step * m_t

        # tag at last valid position (mask assumed contiguous prefix,
        # torchcrf-style, with mask[:, 0] == 1)
        last_oh = jnp.where(keep, oh_t, last_oh)

        # denominator: forward step as a max-shifted matmul on the MXU
        m = jnp.max(alpha, axis=-1, keepdims=True)
        p = jnp.exp(alpha - m)                        # (tb, Lp)
        s = jnp.dot(p, exp_trans, preferred_element_type=jnp.float32)
        nxt = jnp.log(jnp.maximum(s, 1e-30)) + m + t_max + em_t
        alpha = jnp.where(keep, nxt, alpha)
        return score, alpha, oh_t, last_oh

    score, alpha, _, last_oh = jax.lax.fori_loop(
        1, seq_len, body, (score0, alpha0, oh0, oh0))

    score = score + jnp.sum(end * last_oh, axis=-1, keepdims=True)
    y = alpha + end
    mx = jnp.max(y, axis=-1, keepdims=True)
    denom = jnp.log(jnp.sum(jnp.exp(y - mx), axis=-1, keepdims=True)) + mx
    neg_llh_sum = -jnp.sum(score - denom)             # scalar: tile partial

    # lane-dense (8,128) output block: value at [0,0], zeros elsewhere
    ii = jax.lax.broadcasted_iota(jnp.int32, (8, 128), 0)
    jj = jax.lax.broadcasted_iota(jnp.int32, (8, 128), 1)
    o_ref[...] = jnp.where((ii == 0) & (jj == 0), neg_llh_sum, 0.0)


# ---------------------------------------------------------------------------
# Kernel wrappers
# ---------------------------------------------------------------------------
def _cparams(sem):
    return pltpu.CompilerParams(dimension_semantics=sem,
                                vmem_limit_bytes=VMEM_LIMIT)


def linear_qkv(x, w_qkv, b_qkv, out_dim):
    M, K = x.shape
    N3 = w_qkv.shape[1]
    tm = _pick_tile(M, TM_TARGET)
    sds = jax.ShapeDtypeStruct((M, out_dim), jnp.bfloat16)
    return pl.pallas_call(
        _qkv_kernel,
        grid=(M // tm,),
        in_specs=[pl.BlockSpec((tm, K), lambda i: (i, 0)),
                  pl.BlockSpec((K, N3), lambda i: (0, 0)),    # resident weight
                  pl.BlockSpec((1, N3), lambda i: (0, 0))],
        out_specs=[pl.BlockSpec((tm, out_dim), lambda i: (i, 0)),
                   pl.BlockSpec((tm, out_dim), lambda i: (i, 0)),
                   pl.BlockSpec((tm, out_dim), lambda i: (i, 0))],
        out_shape=(sds, sds, sds),
        compiler_params=_cparams(("parallel",)),
    )(x, w_qkv, b_qkv)


def linear_act(x, w, b, activation=None, out_dtype=jnp.bfloat16):
    M, K = x.shape
    N = w.shape[1]
    tm = _pick_tile(M, TM_TARGET)
    return pl.pallas_call(
        functools.partial(_linear_act_kernel, activation=activation),
        grid=(M // tm,),
        in_specs=[pl.BlockSpec((tm, K), lambda i: (i, 0)),
                  pl.BlockSpec((K, N), lambda i: (0, 0)),     # resident weight
                  pl.BlockSpec((1, N), lambda i: (0, 0))],
        out_specs=pl.BlockSpec((tm, N), lambda i: (i, 0)),
        out_shape=jax.ShapeDtypeStruct((M, N), out_dtype),
        compiler_params=_cparams(("parallel",)),
    )(x, w, b)


def linear_res_ln(x, w, b, res, gamma, beta, eps=1e-12):
    M, K = x.shape
    N = w.shape[1]
    tm = _pick_tile(M, TM_TARGET)
    return pl.pallas_call(
        functools.partial(_linear_res_ln_kernel, eps=eps),
        grid=(M // tm,),
        in_specs=[pl.BlockSpec((tm, K), lambda i: (i, 0)),
                  pl.BlockSpec((K, N), lambda i: (0, 0)),     # resident weight
                  pl.BlockSpec((1, N), lambda i: (0, 0)),
                  pl.BlockSpec((tm, N), lambda i: (i, 0)),
                  pl.BlockSpec((1, N), lambda i: (0, 0)),
                  pl.BlockSpec((1, N), lambda i: (0, 0))],
        out_specs=pl.BlockSpec((tm, N), lambda i: (i, 0)),
        out_shape=jax.ShapeDtypeStruct((M, N), jnp.bfloat16),
        compiler_params=_cparams(("parallel",)),
    )(x, w, b, res, gamma, beta)


def layernorm(x, g, b, out_dtype=jnp.bfloat16, eps=1e-12):
    M, D = x.shape
    tm = _pick_tile(M, TM_TARGET)
    return pl.pallas_call(
        functools.partial(_layernorm_kernel, eps=eps),
        grid=(M // tm,),
        in_specs=[pl.BlockSpec((tm, D), lambda i: (i, 0)),
                  pl.BlockSpec((1, D), lambda i: (0, 0)),
                  pl.BlockSpec((1, D), lambda i: (0, 0))],
        out_specs=pl.BlockSpec((tm, D), lambda i: (i, 0)),
        out_shape=jax.ShapeDtypeStruct((M, D), out_dtype),
        compiler_params=_cparams(("parallel",)),
    )(x, g, b)


def multi_head_attention(q, k, v, mask_bias, n_heads):
    B, S, D = q.shape
    dh = D // n_heads
    scale = 1.0 / math.sqrt(dh)
    hpg, gw = _head_grouping(D, n_heads)
    n_groups = D // gw
    qkv_spec = pl.BlockSpec((None, S, gw), lambda b, g: (b, 0, g))
    mb_spec = pl.BlockSpec((None, 1, S), lambda b, g: (b, 0, 0))
    out_spec = pl.BlockSpec((None, S, gw), lambda b, g: (b, 0, g))
    return pl.pallas_call(
        functools.partial(_attention_kernel, heads=hpg, scale=scale),
        grid=(B, n_groups),
        in_specs=[qkv_spec, qkv_spec, qkv_spec, mb_spec],
        out_specs=out_spec,
        out_shape=jax.ShapeDtypeStruct((B, S, D), jnp.bfloat16),
        compiler_params=_cparams(("parallel", "parallel")),
    )(q, k, v, mask_bias)


def crf_neg_log_likelihood(em_bsl, lab_bs1, mask_bs1, trans, start, end, S):
    B, _, Lp = em_bsl.shape
    tb = _pick_batch_tile(B, S, Lp)
    nt = B // tb
    out = pl.pallas_call(
        functools.partial(_crf_nll_kernel, seq_len=S),
        grid=(nt,),
        in_specs=[pl.BlockSpec((tb, S, Lp), lambda i: (i, 0, 0)),
                  pl.BlockSpec((tb, S, 1), lambda i: (i, 0, 0)),
                  pl.BlockSpec((tb, S, 1), lambda i: (i, 0, 0)),
                  pl.BlockSpec((Lp, Lp), lambda i: (0, 0)),
                  pl.BlockSpec((1, Lp), lambda i: (0, 0)),
                  pl.BlockSpec((1, Lp), lambda i: (0, 0))],
        out_specs=pl.BlockSpec((8, 128), lambda i: (i, 0)),
        out_shape=jax.ShapeDtypeStruct((nt * 8, 128), jnp.float32),
        compiler_params=_cparams(("parallel",)),
    )(em_bsl, lab_bs1, mask_bs1, trans, start, end)
    return jnp.sum(out)            # sum over tiles (per-tile -sum(llh))


# ---------------------------------------------------------------------------
# Parameters & model glue
# ---------------------------------------------------------------------------
def init_params(key, cfg):
    def normal(k, shape, scale=0.02):
        return scale * jax.random.normal(k, shape, jnp.float32)

    keys = iter(jax.random.split(key, 256))
    D, Fd, NL = cfg["dim"], cfg["ffn"], cfg["num_labels"]
    params = {
        "word_emb": normal(next(keys), (cfg["vocab"], D)),
        "pos_emb": normal(next(keys), (cfg["max_pos"], D)),
        "emb_ln_g": jnp.ones((1, D), jnp.float32),
        "emb_ln_b": jnp.zeros((1, D), jnp.float32),
        "cls_w": normal(next(keys), (D, NL)),
        "cls_b": jnp.zeros((1, NL), jnp.float32),
        "crf_start": normal(next(keys), (1, NL), 0.1),
        "crf_end": normal(next(keys), (1, NL), 0.1),
        "crf_trans": normal(next(keys), (NL, NL), 0.1),
        "layers": [],
    }
    for _ in range(cfg["layers"]):
        params["layers"].append({
            "wq": normal(next(keys), (D, D)), "bq": jnp.zeros((1, D), jnp.float32),
            "wk": normal(next(keys), (D, D)), "bk": jnp.zeros((1, D), jnp.float32),
            "wv": normal(next(keys), (D, D)), "bv": jnp.zeros((1, D), jnp.float32),
            "wo": normal(next(keys), (D, D)), "bo": jnp.zeros((1, D), jnp.float32),
            "sa_ln_g": jnp.ones((1, D), jnp.float32),
            "sa_ln_b": jnp.zeros((1, D), jnp.float32),
            "w1": normal(next(keys), (D, Fd)), "b1": jnp.zeros((1, Fd), jnp.float32),
            "w2": normal(next(keys), (Fd, D)), "b2": jnp.zeros((1, D), jnp.float32),
            "out_ln_g": jnp.ones((1, D), jnp.float32),
            "out_ln_b": jnp.zeros((1, D), jnp.float32),
        })
    return params


def prepare_params(params):
    """One-time param prep: bf16 casts, QKV concat, label-dim lane padding."""
    NL = params["cls_w"].shape[1]
    Lp = max(128, ((NL + 127) // 128) * 128)
    pad = Lp - NL
    prep = {
        "word_emb": params["word_emb"],
        "pos_emb": params["pos_emb"],
        "emb_ln_g": params["emb_ln_g"], "emb_ln_b": params["emb_ln_b"],
        "cls_w": jnp.pad(params["cls_w"], ((0, 0), (0, pad))).astype(jnp.bfloat16),
        "cls_b": jnp.concatenate(
            [params["cls_b"], jnp.full((1, pad), NEG, jnp.float32)], axis=1),
        "crf_trans": jnp.pad(params["crf_trans"], ((0, pad), (0, pad)),
                             constant_values=NEG),
        "crf_start": jnp.pad(params["crf_start"], ((0, 0), (0, pad)),
                             constant_values=NEG),
        "crf_end": jnp.pad(params["crf_end"], ((0, 0), (0, pad)),
                           constant_values=NEG),
        "layers": [],
    }
    for lyr in params["layers"]:
        prep["layers"].append({
            "w_qkv": jnp.concatenate([lyr["wq"], lyr["wk"], lyr["wv"]],
                                     axis=1).astype(jnp.bfloat16),
            "b_qkv": jnp.concatenate([lyr["bq"], lyr["bk"], lyr["bv"]], axis=1),
            "wo": lyr["wo"].astype(jnp.bfloat16), "bo": lyr["bo"],
            "sa_ln_g": lyr["sa_ln_g"], "sa_ln_b": lyr["sa_ln_b"],
            "w1": lyr["w1"].astype(jnp.bfloat16), "b1": lyr["b1"],
            "w2": lyr["w2"].astype(jnp.bfloat16), "b2": lyr["b2"],
            "out_ln_g": lyr["out_ln_g"], "out_ln_b": lyr["out_ln_b"],
        })
    return prep


def distilkobert_crf_loss(prep, input_ids, attn_mask, labels, cfg):
    B, S = input_ids.shape
    D, H = cfg["dim"], cfg["heads"]
    M = B * S
    Lp = prep["cls_w"].shape[1]

    # Embeddings (gather kept in plain-JAX glue), then LayerNorm in a kernel.
    x = (prep["word_emb"][input_ids]
         + prep["pos_emb"][jnp.arange(S)][None]).reshape(M, D)
    x = layernorm(x.astype(jnp.float32),
                  prep["emb_ln_g"], prep["emb_ln_b"])            # (M, D) bf16

    # Additive attention-mask bias (masked_fill(mask==0, -inf) equivalent).
    mask_bias = ((1.0 - attn_mask.astype(jnp.float32)) * NEG).reshape(B, 1, S)

    for layer in prep["layers"]:
        # fused QKV projection (x read once, resident (D,3D) weight)
        q, k, v = linear_qkv(x, layer["w_qkv"], layer["b_qkv"], D)

        # attention (token-major layout, lane-dense head groups)
        ctx = multi_head_attention(q.reshape(B, S, D), k.reshape(B, S, D),
                                   v.reshape(B, S, D), mask_bias, H)

        # out-proj + residual + LayerNorm fused
        x = linear_res_ln(ctx.reshape(M, D), layer["wo"], layer["bo"],
                          x, layer["sa_ln_g"], layer["sa_ln_b"])

        # FFN: GELU linear, then w2 + residual + LayerNorm fused
        h1 = linear_act(x, layer["w1"], layer["b1"], activation="gelu")
        x = linear_res_ln(h1, layer["w2"], layer["b2"],
                          x, layer["out_ln_g"], layer["out_ln_b"])

    # dropout(p=0.1) is identity in eval mode (no RNG dropout applied)

    # classifier with lane-padded label dim (NL -> Lp); emissions stay (B,S,Lp)
    emissions = linear_act(x, prep["cls_w"], prep["cls_b"], activation=None,
                           out_dtype=jnp.float32)                # (M, Lp)

    em_bsl = emissions.reshape(B, S, Lp)                         # no transpose
    lab_bs1 = labels.astype(jnp.int32).reshape(B, S, 1)
    mask_bs1 = attn_mask.astype(jnp.float32).reshape(B, S, 1)

    # TODO(synk): labels=None branch (CRF Viterbi decode) not implemented;
    # this script implements the training-path loss returned by forward().
    neg_llh_sum = crf_neg_log_likelihood(em_bsl, lab_bs1, mask_bs1,
                                         prep["crf_trans"], prep["crf_start"],
                                         prep["crf_end"], S)
    return neg_llh_sum / B           # reduction='mean' over batch, negated


if __name__ == "__main__":
    cfg = dict(dim=32, ffn=64, heads=2, layers=2, vocab=64, max_pos=16,
               num_labels=5)
    B, S = 2, 8

    key = jax.random.PRNGKey(0)
    pkey, ikey, lkey = jax.random.split(key, 3)
    params = init_params(pkey, cfg)
    prep = prepare_params(params)      # one-time bf16 cast / QKV concat / pads

    input_ids = jax.random.randint(ikey, (B, S), 0, cfg["vocab"], jnp.int32)
    attn_masks = jnp.array([[1, 1, 1, 1, 1, 1, 1, 1],
                            [1, 1, 1, 1, 1, 1, 0, 0]], dtype=jnp.int32)
    labels = jax.random.randint(lkey, (B, S), 0, cfg["num_labels"], jnp.int32)

    loss = distilkobert_crf_loss(prep, input_ids, attn_masks, labels, cfg)
    jax.block_until_ready(loss)
    print("KERNEL_OK")
</pallas_src>

<mosaic_0001>
module attributes {stable_mosaic.version = 11 : i64} {
  func.func @_layernorm_kernel(%arg0: i32, %arg1: memref<16x32xf32, #tpu.memory_space<vmem>>, %arg2: memref<1x32xf32, #tpu.memory_space<vmem>>, %arg3: memref<1x32xf32, #tpu.memory_space<vmem>>, %arg4: memref<16x32xbf16, #tpu.memory_space<vmem>>) attributes {dimension_semantics = [#tpu.dimension_semantics<parallel>], iteration_bounds = array<i64: 1>, scalar_prefetch = 0 : i64, scratch_operands = 0 : i64, tpu.core_type = #tpu.core_type<tc>, window_params = [{transform_indices = @transform_0, window_bounds = array<i64: 16, 32>}, {pipeline_mode = #tpu.pipeline_mode<synchronous>, transform_indices = @transform_1, window_bounds = array<i64: 1, 32>}, {pipeline_mode = #tpu.pipeline_mode<synchronous>, transform_indices = @transform_2, window_bounds = array<i64: 1, 32>}, {transform_indices = @transform_3, window_bounds = array<i64: 16, 32>}]} {
    %c0 = arith.constant 0 : index
    %c0_0 = arith.constant 0 : index
    %0 = vector.load %arg1[%c0, %c0_0] : memref<16x32xf32, #tpu.memory_space<vmem>>, vector<16x32xf32>
    %cst = arith.constant dense<0.000000e+00> : vector<16xf32>
    %1 = vector.multi_reduction <add>, %0, %cst [1] : vector<16x32xf32> to vector<16xf32>
    %2 = vector.shape_cast %1 : vector<16xf32> to vector<16x1xf32>
    %cst_1 = arith.constant 3.200000e+01 : f32
    %3 = vector.broadcast %cst_1 : f32 to vector<16x1xf32>
    %4 = arith.divf %2, %3 : vector<16x1xf32>
    %5 = vector.broadcast %4 : vector<16x1xf32> to vector<16x32xf32>
    %6 = arith.subf %0, %5 : vector<16x32xf32>
    %7 = arith.mulf %6, %6 : vector<16x32xf32>
    %cst_2 = arith.constant dense<0.000000e+00> : vector<16xf32>
    %8 = vector.multi_reduction <add>, %7, %cst_2 [1] : vector<16x32xf32> to vector<16xf32>
    %9 = vector.shape_cast %8 : vector<16xf32> to vector<16x1xf32>
    %cst_3 = arith.constant 3.200000e+01 : f32
    %10 = vector.broadcast %cst_3 : f32 to vector<16x1xf32>
    %11 = arith.divf %9, %10 : vector<16x1xf32>
    %12 = vector.broadcast %4 : vector<16x1xf32> to vector<16x32xf32>
    %13 = arith.subf %0, %12 : vector<16x32xf32>
    %cst_4 = arith.constant 9.99999996E-13 : f32
    %14 = vector.broadcast %cst_4 : f32 to vector<16x1xf32>
    %15 = arith.addf %11, %14 : vector<16x1xf32>
    %16 = math.rsqrt %15 : vector<16x1xf32>
    %17 = vector.broadcast %16 : vector<16x1xf32> to vector<16x32xf32>
    %18 = arith.mulf %13, %17 : vector<16x32xf32>
    %c0_5 = arith.constant 0 : index
    %c0_6 = arith.constant 0 : index
    %19 = vector.load %arg2[%c0_5, %c0_6] : memref<1x32xf32, #tpu.memory_space<vmem>>, vector<1x32xf32>
    %20 = vector.broadcast %19 : vector<1x32xf32> to vector<16x32xf32>
    %21 = arith.mulf %18, %20 : vector<16x32xf32>
    %c0_7 = arith.constant 0 : index
    %c0_8 = arith.constant 0 : index
    %22 = vector.load %arg3[%c0_7, %c0_8] : memref<1x32xf32, #tpu.memory_space<vmem>>, vector<1x32xf32>
    %23 = vector.broadcast %22 : vector<1x32xf32> to vector<16x32xf32>
    %24 = arith.addf %21, %23 : vector<16x32xf32>
    %25 = arith.truncf %24 : vector<16x32xf32> to vector<16x32xbf16>
    %c0_9 = arith.constant 0 : index
    %c0_10 = arith.constant 0 : index
    %26 = vector.load %arg4[%c0_9, %c0_10] : memref<16x32xbf16, #tpu.memory_space<vmem>>, vector<16x32xbf16>
    tpu.vector_store %arg4[%c0_9, %c0_10], %25 {strides = array<i32>} : memref<16x32xbf16, #tpu.memory_space<vmem>>, vector<16x32xbf16>,
    return
  }
  func.func @transform_0(%arg0: i32) -> (i32, i32) {
    %c0_i32 = arith.constant 0 : i32
    %c0_i32_0 = arith.constant 0 : i32
    return %arg0, %c0_i32 : i32, i32
  }
  func.func @transform_1(%arg0: i32) -> (i32, i32) {
    %c0_i32 = arith.constant 0 : i32
    %c0_i32_0 = arith.constant 0 : i32
    %c0_i32_1 = arith.constant 0 : i32
    return %c0_i32, %c0_i32_0 : i32, i32
  }
  func.func @transform_2(%arg0: i32) -> (i32, i32) {
    %c0_i32 = arith.constant 0 : i32
    %c0_i32_0 = arith.constant 0 : i32
    %c0_i32_1 = arith.constant 0 : i32
    return %c0_i32, %c0_i32_0 : i32, i32
  }
  func.func @transform_3(%arg0: i32) -> (i32, i32) {
    %c0_i32 = arith.constant 0 : i32
    %c0_i32_0 = arith.constant 0 : i32
    return %arg0, %c0_i32 : i32, i32
  }
}

</mosaic_0001>

<bundles_post_ra>
// kernel: tpu_custom_call.1
= control target key start
LH: loop header
LB: loop body
LE: loop exit
PB: predicated region body
PF: predicated region fallthrough
CT: control target
= control target key end

     0   :  { %8 = vsyncpa [#allocation3], 0  ;;  %s229_s0 = inlined_call_operand.hbm [shape: f32[16,32], index: 0, kind: input, shape index: {}]   ;;  %s230_s1 = inlined_call_operand.vmem [shape: f32[1,32], index: 1, kind: input, shape index: {}]   ;;  %s231_s2 = inlined_call_operand.vmem [shape: f32[1,32], index: 2, kind: input, shape index: {}]   ;;  %s232_s3 = inlined_call_operand.hbm [shape: bf16[16,32], index: 3, kind: output, shape index: {}]  }
   0x1   :  { %9 = vsyncpa [#allocation4], 0  ;;  %s169_s12 = smov [#allocation2]   ;;  %s121_s16 = scalar_lea.hbm %s229_s0, 256 }
   0x2   :  { %s15_s13 = sshll.u32 %s169_s12, 4  ;;  %p122_p0 = scmp.ne.s32.totalorder %s229_s0, %s121_s16  ;;  %s16_s13 = int_to_ptr.vmem [resolvable:$true] %s15_s13 }
   0x3   :  { %p125_p1 = scmp.lt.u32.totalorder %s121_s16, %s229_s0 }
   0x5   :  { %p127_p2 = pnand %p125_p1, %p122_p0 }
   0x7   :  { %130 = shalt.err (!%p127_p2)
}
   0x8   :  { %s131_s21 = scalar_lea.vmem %s16_s13, 256  ;;  %p136_p4 = scmp.lt.s32.totalorder %s16_s13, %s16_s13 }
   0x9   :  { %p132_p3 = scmp.ne.s32.totalorder %s16_s13, %s131_s21  ;;  %p137_p5 = scmp.lt.s32.totalorder %s131_s21, %s131_s21 }
   0xb   :  { %p138_p6 = por %p137_p5, %p136_p4 }
   0xd   :  { %p139_p7 = pnand %p138_p6, %p132_p3 }
   0xf   :  { %142 = shalt.err (!%p139_p7)
}
  0x10   :  { %s170_s22 = smov 128   ;;  %s171_s23 = smov 8  }
  0x11   :  { %21 = dma.hbm_to_vmem [thread:$0]  %s229_s0, 256, %s16_s13, [#allocation3], %s170_s22, %s170_s22, %s171_s23  }
  0x12   :  { %165 = dma.done.wait [#allocation3], 256  }
  0x13   :  { %166 = vsyncadd [#allocation3], 4294967040  ;;  %vm31_vm0 = vcmask 261120   ;;  %v29_v0 = vld [vmem:[#allocation2] sm:$0xff]  ;;  %v30_v1 = vld [vmem:[#allocation2 + $0x8] sm:$0xff]  ;;  %vm85_vm1 = vcmask 257024  }
  0x14   :  { %v32_v2 = vsel %vm31_vm0, %v29_v0, 0.0  ;;  %v35_v3 = vsel %vm31_vm0, %v30_v1, 0.0  ;;  %v105_v21 = vld [vmem:[%s230_s1] ss:$0 sm:$0xff]  ;;  %s172_s29 = smov [#allocation5]  }
  0x15   :  { %33 = vadd.xlane.f32.xlu0 %v32_v2  ;;  %v106_v23 = vld [vmem:[%s231_s2] ss:$0 sm:$0xff]  ;;  %s93_s30 = sshll.u32 %s172_s29, 4  ;;  %s94_s30 = int_to_ptr.vmem [resolvable:$true] %s93_s30 }
  0x16   :  { %s143_s1 = scalar_lea.vmem %s94_s30, 128  ;;  %p148_p9 = scmp.lt.s32.totalorder %s94_s30, %s94_s30 }
  0x17   :  { %p144_p8 = scmp.ne.s32.totalorder %s94_s30, %s143_s1  ;;  %p149_p10 = scmp.lt.s32.totalorder %s143_s1, %s143_s1 }
  0x19   :  { %36 = vadd.xlane.f32.xlu0 %v35_v3  ;;  %p150_p11 = por %p149_p10, %p148_p9 }
  0x1b   :  { %p151_p12 = pnand %p150_p11, %p144_p8 }
  0xa2   :  { %v34_v4 = vpop.xlane.xlu0 %33 }
  0xa3   :  { %v39_v5 = vmul.f32 0.03125, %v34_v4 }
  0xa5   :  { %v41_v6 = vsub.f32 %v29_v0, %v39_v5 }
  0xa6   :  { %v37_v7 = vpop.xlane.xlu0 %36 }
  0xa7   :  { %v40_v8 = vmul.f32 0.03125, %v37_v7  ;;  %v43_v9 = vmul.f32 %v41_v6, %v41_v6 }
  0xa9   :  { %v42_v10 = vsub.f32 %v30_v1, %v40_v8  ;;  %v45_v11 = vsel %vm31_vm0, %v43_v9, 0.0 }
  0xaa   :  { %46 = vadd.xlane.f32.xlu1 %v45_v11 }
  0xab   :  { %v44_v12 = vmul.f32 %v42_v10, %v42_v10 }
  0xad   :  { %v48_v13 = vsel %vm31_vm0, %v44_v12, 0.0 }
  0xae   :  { %49 = vadd.xlane.f32.xlu1 %v48_v13 }
 0x137   :  { %v47_v14 = vpop.xlane.xlu1 %46 }
 0x138   :  { %v51_v15 = vmul.f32 0.03125, %v47_v14 }
 0x13a   :  { %v53_v16 = vadd.f32 1e-12, %v51_v15 }
 0x13b   :  { %v50_v17 = vpop.xlane.xlu1 %49 }
 0x13c   :  { %117 = vrsqrt.f32 %v53_v16  ;;  %v52_v18 = vmul.f32 0.03125, %v50_v17 }
 0x13e   :  { %v54_v19 = vadd.f32 1e-12, %v52_v18 }
 0x140   :  { %119 = vrsqrt.f32 %v54_v19 }
 0x146   :  { %v118_v20 = vpop.eup %117 }
 0x147   :  { %v57_v22 = vmul.f32 %v118_v20, %v41_v6 }
 0x149   :  { %v66_v24 = vmul.f32 %v105_v21, %v57_v22 }
 0x14a   :  { %v120_v25 = vpop.eup %119 }
 0x14b   :  { %v58_v26 = vmul.f32 %v120_v25, %v42_v10  ;;  %v75_v27 = vadd.f32 %v106_v23, %v66_v24 }
 0x14d   :  { %v67_v28 = vmul.f32 %v105_v21, %v58_v26  ;;  %v109_v29 = vpack.c.bf16 %v75_v27, %v75_v27 }
 0x14f   :  { %v76_v30 = vadd.f32 %v106_v23, %v67_v28  ;;  %86 = vst.msk [vmem:[#allocation5] sm:$0xf] %vm85_vm1, %v109_v29 }
 0x151   :  { %v110_v31 = vpack.c.bf16 %v76_v30, %v76_v30 }
 0x153   :  { %87 = vst.msk [vmem:[#allocation5 + $0x4] sm:$0xf] %vm85_vm1, %v110_v31 }
 0x154   :  { %154 = shalt.err (!%p151_p12)
}
 0x155   :  { %s155_s5 = scalar_lea.hbm %s232_s3, 128 }
 0x156   :  { %p156_p13 = scmp.ne.s32.totalorder %s232_s3, %s155_s5  ;;  %p159_p0 = scmp.lt.u32.totalorder %s155_s5, %s232_s3 }
 0x158   :  { %p161_p1 = pnand %p159_p0, %p156_p13 }
 0x15a   :  { %164 = shalt.err (!%p161_p1)
}
 0x15b   :  { %s173_s10 = smov 64   ;;  %s174_s11 = smov 4  }
 0x15c   :  { %99 = dma.vmem_to_hbm [thread:$0]  %s94_s30, 128, %s232_s3, [#allocation4], %s173_s10, %s173_s10, %s174_s11  }
 0x15d   :  { %167 = dma.done.wait [#allocation4], 128  }
 0x15e   :  { %168 = vsyncadd [#allocation4], 4294967168 }
 0x15f   :  { %103 = vsyncpa [#allocation3], 1 }
 0x160   :  { %104 = vsyncpa [#allocation4], 1 }

</bundles_post_ra>
